<compile_context>
chip_gen: v6e
topology: v6e:2x2x1
jax: 0.10.0
libtpu: 0.0.40
codegen_flags: <defaults>
</compile_context>

<pallas_src>
import functools

import jax
import jax.numpy as jnp
from jax.experimental import pallas as pl
from jax.experimental.pallas import tpu as pltpu


def _round_up(x: int, m: int) -> int:
    return ((x + m - 1) // m) * m


def _cdiv(a: int, b: int) -> int:
    return -(-a // b)


def _vmem_capacity_bytes() -> int:
    """Physical VMEM of this TPU generation; 64 MiB fallback (v7x-safe)."""
    try:
        return int(pltpu.get_tpu_info().vmem_capacity_bytes)
    except Exception:
        return 64 << 20


# ----------------------------------------------------------------------------- kernels
def _predictor_kernel(x_ref, w_ref, b_ref, o_ref, *, apply_relu: bool):
    # x_ref: (tm, in_dim_p)  w_ref: (in_dim_p, out_dim_p)  b_ref: (1, out_dim_p)
    # MXU matmul with f32 accumulation; bias + ReLU epilogue stays f32 on the VPU
    # (safe on v5e, which has no bf16 VPU path).
    acc = jnp.dot(x_ref[...], w_ref[...], preferred_element_type=jnp.float32)
    acc = acc + b_ref[...].astype(jnp.float32)
    if apply_relu:
        acc = jnp.maximum(acc, 0.0)
    o_ref[...] = acc.astype(o_ref.dtype)


def _predictor_kernel_ktiled(x_ref, w_ref, b_ref, o_ref, acc_ref, *, apply_relu: bool):
    # K-tiled variant (P3 pattern): grid = (row_tiles, k_tiles), k is a reduction.
    k = pl.program_id(1)

    @pl.when(k == 0)
    def _():
        acc_ref[...] = jnp.zeros_like(acc_ref)

    acc_ref[...] += jnp.dot(x_ref[...], w_ref[...],
                            preferred_element_type=jnp.float32)

    @pl.when(k == pl.num_programs(1) - 1)
    def _():
        acc = acc_ref[...] + b_ref[...].astype(jnp.float32)
        if apply_relu:
            acc = jnp.maximum(acc, 0.0)
        o_ref[...] = acc.astype(o_ref.dtype)


# ----------------------------------------------------------------------------- params
def prepare_predictor_params(weight, bias, *, compute_dtype=None):
    """One-time parameter prep (do NOT call per forward).

    weight: [out_dim, in_dim] (PyTorch nn.Linear layout);  bias: [out_dim]
    Returns (w_t [in_dim_p, out_dim_p], bias2d [1, out_dim_p], out_dim).

    Lane-padding policy: out_dim is padded to a multiple of 128 only when it is
    already >= 128 (for tiny out_dim, padding would 8x the dominant output HBM
    stream and force an extra slice pass; masked stores are cheaper there).
    in_dim is padded to a multiple of 128 only when > 128 (lane-dense x DMAs).
    """
    out_dim, in_dim = weight.shape
    out_dim_p = _round_up(out_dim, 128) if out_dim >= 128 else out_dim
    in_dim_p = _round_up(in_dim, 128) if in_dim > 128 else in_dim

    w_t = jnp.asarray(weight).T                       # [in_dim, out_dim]
    if (in_dim_p, out_dim_p) != (in_dim, out_dim):
        w_t = jnp.pad(w_t, ((0, in_dim_p - in_dim), (0, out_dim_p - out_dim)))
    b = jnp.asarray(bias)
    if out_dim_p != out_dim:
        b = jnp.pad(b, (0, out_dim_p - out_dim))

    if compute_dtype is not None:
        w_t = w_t.astype(compute_dtype)               # e.g. bf16: halves W HBM + VMEM
    b2 = b.reshape(1, out_dim_p).astype(jnp.float32)  # bias / epilogue stay f32
    return w_t, b2, out_dim


# ----------------------------------------------------------------------------- forward
def predictor_forward(x, w_t, b2, out_dim, *, activation=None, tm=None, tk=None,
                      out_dtype=jnp.float32, force_k_tiling=False):
    """Pallas forward for Predictor.

    x:    [N, in_dim]
    w_t:  [in_dim_p, out_dim_p]  (from prepare_predictor_params)
    b2:   [1, out_dim_p]         (from prepare_predictor_params)
    activation: None or "relu"
    """
    N, in_dim = x.shape
    in_dim_p, out_dim_p = w_t.shape
    assert in_dim_p >= in_dim and out_dim_p >= out_dim

    # x always matmuls in W's dtype -> no silent f32 promotion of a bf16 path.
    compute_dtype = w_t.dtype
    x_item = jnp.dtype(compute_dtype).itemsize
    w_item = jnp.dtype(w_t.dtype).itemsize
    o_item = jnp.dtype(out_dtype).itemsize

    cap = _vmem_capacity_bytes()                 # 128 MiB v5e/v6e, 64 MiB v7x
    budget = cap // 2                            # tiles + resident weights
    vmem_limit = min((cap * 3) // 4, 100 << 20)  # scoped limit for the compiler

    w_resident_bytes = in_dim_p * out_dim_p * w_item + out_dim_p * 4  # single-buffered

    # ---- row tile: balanced, capped, VMEM-budgeted, >=2 grid steps ----------
    tm_cap = 1024 if cap >= (96 << 20) else 512
    if tm is None:
        tm = min(tm_cap, _round_up(N, 8))
    tm = max(8, _round_up(min(tm, _round_up(N, 8)), 8))
    n_tiles = _cdiv(N, tm)
    if N > 8 and n_tiles < 2:
        n_tiles = 2                              # both v7x TensorCores get work
    tm = max(8, _round_up(_cdiv(N, n_tiles), 8))  # balanced: <8 padded rows/tile

    def resident_fits(t):
        # 2x-buffered x tile + 2x-buffered out tile + single-buffered W & bias
        return (2 * t * in_dim_p * x_item
                + 2 * t * out_dim_p * o_item
                + w_resident_bytes) <= budget

    while tm > 8 and not resident_fits(tm):
        tm = _round_up(tm // 2, 8)

    use_k_tiling = force_k_tiling or not resident_fits(tm)

    if use_k_tiling:
        if tk is None:
            tk = in_dim_p
            for cand in (1024, 512, 256, 128):
                if in_dim_p % cand == 0:
                    tk = cand
                    break
        assert in_dim_p % tk == 0 and (tk % 128 == 0 or tk == in_dim_p)

        def ktiled_fits(t, kk):
            return (2 * t * kk * x_item              # x K-slices (double-buffered)
                    + 2 * kk * out_dim_p * w_item    # W K-slices (double-buffered)
                    + 2 * t * out_dim_p * o_item     # output tile (double-buffered)
                    + t * out_dim_p * 4              # f32 accumulator scratch
                    + out_dim_p * 4) <= budget

        while tm > 8 and not ktiled_fits(tm, tk):
            tm = _round_up(tm // 2, 8)
        while tk > 128 and not ktiled_fits(tm, tk):
            tk //= 2

    n_tiles = _cdiv(N, tm)
    n_pad = n_tiles * tm

    # ---- pad / cast x (rows for ragged N, cols if in_dim was lane-padded) ---
    x_p = x
    if x_p.dtype != compute_dtype:
        x_p = x_p.astype(compute_dtype)
    if n_pad != N or in_dim_p != in_dim:
        x_p = jnp.pad(x_p, ((0, n_pad - N), (0, in_dim_p - in_dim)))

    cost = pl.CostEstimate(
        flops=2 * n_pad * in_dim_p * out_dim_p,
        transcendentals=0,
        bytes_accessed=(x_p.size * x_p.dtype.itemsize
                        + w_t.size * w_item
                        + out_dim_p * 4
                        + n_pad * out_dim_p * o_item),
    )

    apply_relu = (activation == "relu")

    def _call(single_buffer_invariants):
        def inv_spec(shape, index_map):
            # Grid-invariant block: a single VMEM buffer is enough.
            if single_buffer_invariants:
                return pl.BlockSpec(shape, index_map, pipeline_mode=pl.Buffered(1))
            return pl.BlockSpec(shape, index_map)

        if not use_k_tiling:
            grid = (n_tiles,)
            in_specs = [
                pl.BlockSpec((tm, in_dim_p), lambda i: (i, 0)),        # x row-tile
                inv_spec((in_dim_p, out_dim_p), lambda i: (0, 0)),     # W^T resident
                inv_spec((1, out_dim_p), lambda i: (0, 0)),            # bias resident
            ]
            out_specs = pl.BlockSpec((tm, out_dim_p), lambda i: (i, 0))
            kernel = functools.partial(_predictor_kernel, apply_relu=apply_relu)
            scratch = []
            dims = ("parallel",)
        else:
            k_tiles = in_dim_p // tk
            grid = (n_tiles, k_tiles)
            in_specs = [
                pl.BlockSpec((tm, tk), lambda i, k: (i, k)),           # x K-slice
                pl.BlockSpec((tk, out_dim_p), lambda i, k: (k, 0)),    # W K-slice
                inv_spec((1, out_dim_p), lambda i, k: (0, 0)),         # bias resident
            ]
            out_specs = pl.BlockSpec((tm, out_dim_p), lambda i, k: (i, 0))
            kernel = functools.partial(_predictor_kernel_ktiled, apply_relu=apply_relu)
            scratch = [pltpu.VMEM((tm, out_dim_p), jnp.float32)]
            dims = ("parallel", "arbitrary")

        return pl.pallas_call(
            kernel,
            out_shape=jax.ShapeDtypeStruct((n_pad, out_dim_p), out_dtype),
            grid_spec=pltpu.PrefetchScalarGridSpec(
                num_scalar_prefetch=0,
                grid=grid,
                in_specs=in_specs,
                out_specs=out_specs,
                scratch_shapes=scratch,
            ),
            compiler_params=pltpu.CompilerParams(
                dimension_semantics=dims,
                vmem_limit_bytes=vmem_limit,
            ),
            cost_estimate=cost,
        )(x_p, w_t, b2)

    try:
        out_p = _call(single_buffer_invariants=True)
    except Exception:
        # pl.Buffered(1) not supported by this JAX build -> default buffering.
        out_p = _call(single_buffer_invariants=False)

    out = out_p
    if n_pad != N:
        out = out[:N]                    # row slice only when rows were padded
    if out_dim_p != out_dim:
        out = out[:, :out_dim]           # lane slice only when lanes were padded
    return out


def xavier_uniform(key, out_dim, in_dim, dtype=jnp.float32):
    # Matches torch.nn.init.xavier_uniform_ (gain=1): U(-a, a), a=sqrt(6/(fan_in+fan_out))
    a = jnp.sqrt(6.0 / (in_dim + out_dim))
    return jax.random.uniform(key, (out_dim, in_dim), dtype, minval=-a, maxval=a)


if __name__ == "__main__":
    key = jax.random.PRNGKey(0)
    k_x, k_w, k_b, k_x2 = jax.random.split(key, 4)

    N, in_dim, out_dim = 64, 32, 16   # small shapes consistent with Predictor(in_dim, out_dim)

    x = jax.random.normal(k_x, (N, in_dim), dtype=jnp.float32)
    weight = xavier_uniform(k_w, out_dim, in_dim)
    bound = 1.0 / jnp.sqrt(in_dim)    # PyTorch nn.Linear default bias init
    bias = jax.random.uniform(k_b, (out_dim,), jnp.float32, minval=-bound, maxval=bound)

    # One-time parameter prep (transpose + padding hoisted out of forward).
    w_t, b2, od = prepare_predictor_params(weight, bias)

    # --- f32 path with ReLU activation (act=torch.relu analogue) -------------
    out = predictor_forward(x, w_t, b2, od, activation="relu")
    out = jax.block_until_ready(out)
    ref = jnp.maximum(x @ weight.T + bias, 0.0)
    assert out.shape == (N, out_dim)
    assert jnp.allclose(out, ref, atol=1e-5, rtol=1e-5)

    # --- ragged N + multi-step row grid, act=None (identity) -----------------
    N2 = 100
    x2 = jax.random.normal(k_x2, (N2, in_dim), dtype=jnp.float32)
    out2 = predictor_forward(x2, w_t, b2, od, activation=None, tm=32)
    out2 = jax.block_until_ready(out2)
    ref2 = x2 @ weight.T + bias
    assert out2.shape == (N2, out_dim)
    assert jnp.allclose(out2, ref2, atol=1e-5, rtol=1e-5)

    # --- bf16 compute path (halves x/W HBM traffic; looser tolerance) --------
    w_t_bf, b2_bf, od_bf = prepare_predictor_params(weight, bias,
                                                    compute_dtype=jnp.bfloat16)
    out3 = predictor_forward(x, w_t_bf, b2_bf, od_bf, activation="relu")
    out3 = jax.block_until_ready(out3)
    assert out3.shape == (N, out_dim)
    assert jnp.allclose(out3.astype(jnp.float32), ref, atol=5e-2, rtol=5e-2)

    # --- forced K-tiled reduction path (large-in_dim fallback, small shapes) -
    k_w4, k_b4, k_x4 = jax.random.split(jax.random.PRNGKey(1), 3)
    in_dim4, N4 = 256, 48
    weight4 = xavier_uniform(k_w4, out_dim, in_dim4)
    bias4 = jax.random.uniform(k_b4, (out_dim,), jnp.float32,
                               minval=-1.0 / 16, maxval=1.0 / 16)
    x4 = jax.random.normal(k_x4, (N4, in_dim4), dtype=jnp.float32)
    w_t4, b24, od4 = prepare_predictor_params(weight4, bias4)
    out4 = predictor_forward(x4, w_t4, b24, od4, activation="relu",
                             force_k_tiling=True, tk=128)
    out4 = jax.block_until_ready(out4)
    ref4 = jnp.maximum(x4 @ weight4.T + bias4, 0.0)
    assert out4.shape == (N4, out_dim)
    assert jnp.allclose(out4, ref4, atol=1e-4, rtol=1e-4)

    print("KERNEL_OK")
</pallas_src>

<mosaic_0001>
module attributes {stable_mosaic.version = 11 : i64} {
  func.func @_predictor_kernel(%arg0: i32, %arg1: memref<32x32xf32, #tpu.memory_space<vmem>>, %arg2: memref<32x16xf32, #tpu.memory_space<vmem>>, %arg3: memref<1x16xf32, #tpu.memory_space<vmem>>, %arg4: memref<32x16xf32, #tpu.memory_space<vmem>>) attributes {dimension_semantics = [#tpu.dimension_semantics<parallel>], iteration_bounds = array<i64: 2>, scalar_prefetch = 0 : i64, scratch_operands = 0 : i64, tpu.core_type = #tpu.core_type<tc>, window_params = [{transform_indices = @transform_0, window_bounds = array<i64: 32, 32>}, {pipeline_mode = #tpu.pipeline_mode<synchronous>, transform_indices = @transform_1, window_bounds = array<i64: 32, 16>}, {pipeline_mode = #tpu.pipeline_mode<synchronous>, transform_indices = @transform_2, window_bounds = array<i64: 1, 16>}, {transform_indices = @transform_3, window_bounds = array<i64: 32, 16>}]} {
    %c0 = arith.constant 0 : index
    %c0_0 = arith.constant 0 : index
    %0 = vector.load %arg1[%c0, %c0_0] : memref<32x32xf32, #tpu.memory_space<vmem>>, vector<32x32xf32>
    %c0_1 = arith.constant 0 : index
    %c0_2 = arith.constant 0 : index
    %1 = vector.load %arg2[%c0_1, %c0_2] : memref<32x16xf32, #tpu.memory_space<vmem>>, vector<32x16xf32>
    %cst = arith.constant dense<0.000000e+00> : vector<32x16xf32>
    %2 = tpu.matmul %0, %1, %cst {dimension_numbers = #tpu.dot_dimension_numbers<[1], [0], [0], [1], [0, 0, 1, 1], [], []>} : vector<32x32xf32>, vector<32x16xf32>, vector<32x16xf32> -> vector<32x16xf32>
    %c0_3 = arith.constant 0 : index
    %c0_4 = arith.constant 0 : index
    %3 = vector.load %arg3[%c0_3, %c0_4] : memref<1x16xf32, #tpu.memory_space<vmem>>, vector<1x16xf32>
    %4 = vector.broadcast %3 : vector<1x16xf32> to vector<32x16xf32>
    %5 = arith.addf %2, %4 : vector<32x16xf32>
    %cst_5 = arith.constant 0.000000e+00 : f32
    %6 = vector.broadcast %cst_5 : f32 to vector<32x16xf32>
    %7 = arith.maximumf %5, %6 : vector<32x16xf32>
    %c0_6 = arith.constant 0 : index
    %c0_7 = arith.constant 0 : index
    %8 = vector.load %arg4[%c0_6, %c0_7] : memref<32x16xf32, #tpu.memory_space<vmem>>, vector<32x16xf32>
    tpu.vector_store %arg4[%c0_6, %c0_7], %7 {strides = array<i32>} : memref<32x16xf32, #tpu.memory_space<vmem>>, vector<32x16xf32>,
    return
  }
  func.func @transform_0(%arg0: i32) -> (i32, i32) {
    %c0_i32 = arith.constant 0 : i32
    %c0_i32_0 = arith.constant 0 : i32
    return %arg0, %c0_i32 : i32, i32
  }
  func.func @transform_1(%arg0: i32) -> (i32, i32) {
    %c0_i32 = arith.constant 0 : i32
    %c0_i32_0 = arith.constant 0 : i32
    %c0_i32_1 = arith.constant 0 : i32
    return %c0_i32, %c0_i32_0 : i32, i32
  }
  func.func @transform_2(%arg0: i32) -> (i32, i32) {
    %c0_i32 = arith.constant 0 : i32
    %c0_i32_0 = arith.constant 0 : i32
    %c0_i32_1 = arith.constant 0 : i32
    return %c0_i32, %c0_i32_0 : i32, i32
  }
  func.func @transform_3(%arg0: i32) -> (i32, i32) {
    %c0_i32 = arith.constant 0 : i32
    %c0_i32_0 = arith.constant 0 : i32
    return %arg0, %c0_i32 : i32, i32
  }
}

module attributes {stable_mosaic.version = 11 : i64} {
  func.func @_predictor_kernel(%arg0: i32, %arg1: memref<32x32xf32, #tpu.memory_space<vmem>>, %arg2: memref<32x16xf32, #tpu.memory_space<vmem>>, %arg3: memref<1x16xf32, #tpu.memory_space<vmem>>, %arg4: memref<32x16xf32, #tpu.memory_space<vmem>>) attributes {dimension_semantics = [#tpu.dimension_semantics<parallel>], iteration_bounds = array<i64: 2>, scalar_prefetch = 0 : i64, scratch_operands = 0 : i64, tpu.core_type = #tpu.core_type<tc>, window_params = [{transform_indices = @transform_0, window_bounds = array<i64: 32, 32>}, {pipeline_mode = #tpu.pipeline_mode<synchronous>, transform_indices = @transform_1, window_bounds = array<i64: 32, 16>}, {pipeline_mode = #tpu.pipeline_mode<synchronous>, transform_indices = @transform_2, window_bounds = array<i64: 1, 16>}, {transform_indices = @transform_3, window_bounds = array<i64: 32, 16>}]} {
    %c0 = arith.constant 0 : index
    %c0_0 = arith.constant 0 : index
    %0 = vector.load %arg1[%c0, %c0_0] : memref<32x32xf32, #tpu.memory_space<vmem>>, vector<32x32xf32>
    %c0_1 = arith.constant 0 : index
    %c0_2 = arith.constant 0 : index
    %1 = vector.load %arg2[%c0_1, %c0_2] : memref<32x16xf32, #tpu.memory_space<vmem>>, vector<32x16xf32>
    %cst = arith.constant dense<0.000000e+00> : vector<32x16xf32>
    %2 = tpu.matmul %0, %1, %cst {dimension_numbers = #tpu.dot_dimension_numbers<[1], [0], [0], [1], [0, 0, 1, 1], [], []>} : vector<32x32xf32>, vector<32x16xf32>, vector<32x16xf32> -> vector<32x16xf32>
    %c0_3 = arith.constant 0 : index
    %c0_4 = arith.constant 0 : index
    %3 = vector.load %arg3[%c0_3, %c0_4] : memref<1x16xf32, #tpu.memory_space<vmem>>, vector<1x16xf32>
    %4 = vector.broadcast %3 : vector<1x16xf32> to vector<32x16xf32>
    %5 = arith.addf %2, %4 : vector<32x16xf32>
    %cst_5 = arith.constant 0.000000e+00 : f32
    %6 = vector.broadcast %cst_5 : f32 to vector<32x16xf32>
    %7 = arith.maximumf %5, %6 : vector<32x16xf32>
    %c0_6 = arith.constant 0 : index
    %c0_7 = arith.constant 0 : index
    %8 = vector.load %arg4[%c0_6, %c0_7] : memref<32x16xf32, #tpu.memory_space<vmem>>, vector<32x16xf32>
    tpu.vector_store %arg4[%c0_6, %c0_7], %7 {strides = array<i32>} : memref<32x16xf32, #tpu.memory_space<vmem>>, vector<32x16xf32>,
    return
  }
  func.func @transform_0(%arg0: i32) -> (i32, i32) {
    %c0_i32 = arith.constant 0 : i32
    %c0_i32_0 = arith.constant 0 : i32
    return %arg0, %c0_i32 : i32, i32
  }
  func.func @transform_1(%arg0: i32) -> (i32, i32) {
    %c0_i32 = arith.constant 0 : i32
    %c0_i32_0 = arith.constant 0 : i32
    %c0_i32_1 = arith.constant 0 : i32
    return %c0_i32, %c0_i32_0 : i32, i32
  }
  func.func @transform_2(%arg0: i32) -> (i32, i32) {
    %c0_i32 = arith.constant 0 : i32
    %c0_i32_0 = arith.constant 0 : i32
    %c0_i32_1 = arith.constant 0 : i32
    return %c0_i32, %c0_i32_0 : i32, i32
  }
  func.func @transform_3(%arg0: i32) -> (i32, i32) {
    %c0_i32 = arith.constant 0 : i32
    %c0_i32_0 = arith.constant 0 : i32
    return %arg0, %c0_i32 : i32, i32
  }
}

</mosaic_0001>

<bundles_post_ra>
// kernel: tpu_custom_call.1
= control target key start
LH: loop header
LB: loop body
LE: loop exit
PB: predicated region body
PF: predicated region fallthrough
CT: control target
= control target key end

     0   :  { %s434_s12 = smov 0   ;;  %s469_s0 = inlined_call_operand.vmem [shape: f32[64,32], index: 0, kind: input, shape index: {}]   ;;  %s470_s1 = inlined_call_operand.vmem [shape: f32[32,16], index: 1, kind: input, shape index: {}]   ;;  %s471_s2 = inlined_call_operand.vmem [shape: f32[1,16], index: 2, kind: input, shape index: {}]   ;;  %s472_s3 = inlined_call_operand.vmem [shape: f32[64,16], index: 3, kind: output, shape index: {}]  }
   0x1 LB: > { %s352_s13 = sadd.s32 4294967295, %s412_s12   ;;  %p356_p0 = scmp.ge.s32.totalorder %s412_s12, 1  ;;  %s412_s12 = sphi %s434_s12, %s13_s12  }
   0x2   : > { %p138_p1 = scmp.lt.s32.totalorder %s412_s12, 3 }
   0x4   : > { %p139_p2 = pnand %p356_p0, %p138_p1 }
   0x5   : > { %s357_s18 = sshll.u32 (!%p139_p2), %s352_s13, 2 }
   0x6   : > { %142 = sbr.rel (%p139_p2) target bundleno = 221 (0xdd), region = 32  ;;  %p163_p3 = scmp.lt.s32.totalorder (!%p139_p2), %s357_s18, 7 }
   0xb   : > { %v181_v0 = vld [vmem:[%s470_s1 + $0x18] sm:$0xff]  ;;  %v180_v1 = vld [vmem:[%s470_s1 + $0x10] sm:$0xff]  ;;  %v179_v2 = vld [vmem:[%s470_s1 + $0x8] sm:$0xff]  ;;  %s474_s18 = smov (!%p163_p3, %s357_s18), 7  ;;  %vm189_vm0 = vcmask 261120   ;;  %vm291_vm1 = vcmask 130048  }
   0xc   : > { %376 = vmatprep.subr.mxu0 %v181_v0  ;;  %390 = vmatprep.subr.mxu1 %v181_v0  ;;  %v178_v3 = vld [vmem:[%s470_s1] sm:$0xff]  ;;  %s358_s23 = sshll.u32 %s474_s18, 3 }
   0xd   : > { %377 = vmatpush3.msra.mxu0 %v181_v0  ;;  %394 = vmatpush3.msra.mxu1 %v181_v0  ;;  %s166_s26 = scalar_lea.vmem %s469_s0, %s358_s23  ;;  %v361_v8 = vld [vmem:[%s471_s2] ss:$0 sm:$0xff]  ;;  %s172_s4 = scalar_lea.vmem %s472_s3, %s358_s23 }
   0xe   : > { %378 = vmatprep.subr.mxu0 %v180_v1  ;;  %391 = vmatprep.subr.mxu1 %v180_v1  ;;  %v174_v4 = vld [vmem:[%s166_s26] sm:$0xff]  ;;  %v176_v5 = vld [vmem:[%s166_s26 + $0x10] sm:$0xff]  ;;  %v175_v6 = vld [vmem:[%s166_s26 + $0x8] sm:$0xff] }
   0xf   : > { %379 = vmatpush3.msra.mxu0 %v180_v1  ;;  %395 = vmatpush3.msra.mxu1 %v180_v1  ;;  %v177_v7 = vld [vmem:[%s166_s26 + $0x18] sm:$0xff] }
  0x10   : > { %380 = vmatprep.subr.mxu0 %v179_v2  ;;  %392 = vmatprep.subr.mxu1 %v179_v2 }
  0x11   : > { %381 = vmatpush3.msra.mxu0 %v179_v2  ;;  %396 = vmatpush3.msra.mxu1 %v179_v2 }
  0x12   : > { %382 = vmatprep.subr.mxu0 %v178_v3  ;;  %393 = vmatprep.subr.mxu1 %v178_v3 }
  0x13   : > { %383 = vmatpush3.msra.mxu0 %v178_v3  ;;  %397 = vmatpush3.msra.mxu1 %v178_v3 }
  0x14   : > { %384 = vmatprep.mubr.msk.f32.mxu0 %vm189_vm0, %v174_v4  ;;  %387 = vmatprep.mubr.msk.f32.mxu1 %vm189_vm0, %v176_v5 }
  0x15   : > { %385 = vmatmul.mubr.msk.f32.vlgmr.msra.gmra.mxu0 %vm189_vm0, %v175_v6  ;;  %388 = vmatmul.mubr.msk.f32.vlgmr.msra.gmra.mxu1 %vm189_vm0, %v177_v7 }
  0xd5   : > { %v386_v9 = vpop.f32.mrf.mxu0  ;;  %v389_v10 = vpop.f32.mrf.mxu1 }
  0xd6   : > { %v274_v11 = vadd.f32 %v386_v9, %v361_v8  ;;  %v284_v16 = vadd.f32 %v389_v10, %v361_v8 }
  0xd7   : > { %v268_v12 = vpop.f32.mrf.mxu0  ;;  %v278_v13 = vpop.f32.mrf.mxu1 }
  0xd8   : > { %v269_v14 = vadd.f32 %v361_v8, %v268_v12  ;;  %v279_v15 = vadd.f32 %v361_v8, %v278_v13  ;;  %v288_v18 = vmax.f32 %v274_v11, 0.0  ;;  %v290_v20 = vmax.f32 %v284_v16, 0.0 }
  0xda   : > { %v287_v17 = vmax.f32 %v269_v14, 0.0  ;;  %v289_v19 = vmax.f32 %v279_v15, 0.0  ;;  %293 = vst.msk [vmem:[%s172_s4 + $0x8] sm:$0xff] %vm291_vm1, %v288_v18  ;;  %295 = vst.msk [vmem:[%s172_s4 + $0x18] sm:$0xff] %vm291_vm1, %v290_v20 }
  0xdc   : > { %292 = vst.msk [vmem:[%s172_s4] sm:$0xff] %vm291_vm1, %v287_v17  ;;  %294 = vst.msk [vmem:[%s172_s4 + $0x10] sm:$0xff] %vm291_vm1, %v289_v19 }
  0xdd PF: > { %s13_s12 = sadd.s32 1, %s412_s12  }
  0xde   : > { %p10_p4 = scmp.ge.s32.totalorder %s13_s12, 4  }
  0xe0   :  { %12 = sbr.rel (!%p10_p4) target bundleno = 1 (0x1), region = 62 }

// kernel: tpu_custom_call.1
= control target key start
LH: loop header
LB: loop body
LE: loop exit
PB: predicated region body
PF: predicated region fallthrough
CT: control target
= control target key end

     0   :  { %s434_s12 = smov 0   ;;  %s469_s0 = inlined_call_operand.vmem [shape: f32[64,32], index: 0, kind: input, shape index: {}]   ;;  %s470_s1 = inlined_call_operand.vmem [shape: f32[32,16], index: 1, kind: input, shape index: {}]   ;;  %s471_s2 = inlined_call_operand.vmem [shape: f32[1,16], index: 2, kind: input, shape index: {}]   ;;  %s472_s3 = inlined_call_operand.vmem [shape: f32[64,16], index: 3, kind: output, shape index: {}]  }
   0x1 LB: > { %s352_s13 = sadd.s32 4294967295, %s412_s12   ;;  %p356_p0 = scmp.ge.s32.totalorder %s412_s12, 1  ;;  %s412_s12 = sphi %s434_s12, %s13_s12  }
   0x2   : > { %p138_p1 = scmp.lt.s32.totalorder %s412_s12, 3 }
   0x4   : > { %p139_p2 = pnand %p356_p0, %p138_p1 }
   0x5   : > { %s357_s18 = sshll.u32 (!%p139_p2), %s352_s13, 2 }
   0x6   : > { %142 = sbr.rel (%p139_p2) target bundleno = 221 (0xdd), region = 32  ;;  %p163_p3 = scmp.lt.s32.totalorder (!%p139_p2), %s357_s18, 7 }
   0xb   : > { %v181_v0 = vld [vmem:[%s470_s1 + $0x18] sm:$0xff]  ;;  %v180_v1 = vld [vmem:[%s470_s1 + $0x10] sm:$0xff]  ;;  %v179_v2 = vld [vmem:[%s470_s1 + $0x8] sm:$0xff]  ;;  %s474_s18 = smov (!%p163_p3, %s357_s18), 7  ;;  %vm189_vm0 = vcmask 261120   ;;  %vm291_vm1 = vcmask 130048  }
   0xc   : > { %376 = vmatprep.subr.mxu0 %v181_v0  ;;  %390 = vmatprep.subr.mxu1 %v181_v0  ;;  %v178_v3 = vld [vmem:[%s470_s1] sm:$0xff]  ;;  %s358_s23 = sshll.u32 %s474_s18, 3 }
   0xd   : > { %377 = vmatpush3.msra.mxu0 %v181_v0  ;;  %394 = vmatpush3.msra.mxu1 %v181_v0  ;;  %s166_s26 = scalar_lea.vmem %s469_s0, %s358_s23  ;;  %v361_v8 = vld [vmem:[%s471_s2] ss:$0 sm:$0xff]  ;;  %s172_s4 = scalar_lea.vmem %s472_s3, %s358_s23 }
   0xe   : > { %378 = vmatprep.subr.mxu0 %v180_v1  ;;  %391 = vmatprep.subr.mxu1 %v180_v1  ;;  %v174_v4 = vld [vmem:[%s166_s26] sm:$0xff]  ;;  %v176_v5 = vld [vmem:[%s166_s26 + $0x10] sm:$0xff]  ;;  %v175_v6 = vld [vmem:[%s166_s26 + $0x8] sm:$0xff] }
   0xf   : > { %379 = vmatpush3.msra.mxu0 %v180_v1  ;;  %395 = vmatpush3.msra.mxu1 %v180_v1  ;;  %v177_v7 = vld [vmem:[%s166_s26 + $0x18] sm:$0xff] }
  0x10   : > { %380 = vmatprep.subr.mxu0 %v179_v2  ;;  %392 = vmatprep.subr.mxu1 %v179_v2 }
  0x11   : > { %381 = vmatpush3.msra.mxu0 %v179_v2  ;;  %396 = vmatpush3.msra.mxu1 %v179_v2 }
  0x12   : > { %382 = vmatprep.subr.mxu0 %v178_v3  ;;  %393 = vmatprep.subr.mxu1 %v178_v3 }
  0x13   : > { %383 = vmatpush3.msra.mxu0 %v178_v3  ;;  %397 = vmatpush3.msra.mxu1 %v178_v3 }
  0x14   : > { %384 = vmatprep.mubr.msk.f32.mxu0 %vm189_vm0, %v174_v4  ;;  %387 = vmatprep.mubr.msk.f32.mxu1 %vm189_vm0, %v176_v5 }
  0x15   : > { %385 = vmatmul.mubr.msk.f32.vlgmr.msra.gmra.mxu0 %vm189_vm0, %v175_v6  ;;  %388 = vmatmul.mubr.msk.f32.vlgmr.msra.gmra.mxu1 %vm189_vm0, %v177_v7 }
  0xd5   : > { %v386_v9 = vpop.f32.mrf.mxu0  ;;  %v389_v10 = vpop.f32.mrf.mxu1 }
  0xd6   : > { %v274_v11 = vadd.f32 %v386_v9, %v361_v8  ;;  %v284_v16 = vadd.f32 %v389_v10, %v361_v8 }
  0xd7   : > { %v268_v12 = vpop.f32.mrf.mxu0  ;;  %v278_v13 = vpop.f32.mrf.mxu1 }
  0xd8   : > { %v269_v14 = vadd.f32 %v361_v8, %v268_v12  ;;  %v279_v15 = vadd.f32 %v361_v8, %v278_v13  ;;  %v288_v18 = vmax.f32 %v274_v11, 0.0  ;;  %v290_v20 = vmax.f32 %v284_v16, 0.0 }
  0xda   : > { %v287_v17 = vmax.f32 %v269_v14, 0.0  ;;  %v289_v19 = vmax.f32 %v279_v15, 0.0  ;;  %293 = vst.msk [vmem:[%s172_s4 + $0x8] sm:$0xff] %vm291_vm1, %v288_v18  ;;  %295 = vst.msk [vmem:[%s172_s4 + $0x18] sm:$0xff] %vm291_vm1, %v290_v20 }
  0xdc   : > { %292 = vst.msk [vmem:[%s172_s4] sm:$0xff] %vm291_vm1, %v287_v17  ;;  %294 = vst.msk [vmem:[%s172_s4 + $0x10] sm:$0xff] %vm291_vm1, %v289_v19 }
  0xdd PF: > { %s13_s12 = sadd.s32 1, %s412_s12  }
  0xde   : > { %p10_p4 = scmp.ge.s32.totalorder %s13_s12, 4  }
  0xe0   :  { %12 = sbr.rel (!%p10_p4) target bundleno = 1 (0x1), region = 62 }

</bundles_post_ra>
